<compile_context>
chip_gen: v7x
topology: tpu7x:2x2x1
jax: 0.10.0
libtpu: 0.0.40
codegen_flags: <defaults>
</compile_context>

<pallas_src>
import functools

import jax
import jax.numpy as jnp
from jax import lax
from jax.experimental import pallas as pl
from jax.experimental.pallas import tpu as pltpu

HIDDEN_SIZE = 2  # module-level `hidden_size` used in the PyTorch forward

LANE = 128
SUBLANE = 8


def _round_up(x, m):
    return (x + m - 1) // m * m


def _rnn_kernel(x_ref, wih_ref, whh_ref, bias_ref, out_ref,
                h_scratch, gi_scratch, *, t_blk, b_pad, seq_len, unroll):
    """One grid step == one block of `t_blk` timesteps.

    x_ref      : (t_blk * b_pad, D)        input rows for this time block
    wih_ref    : (D, H_pad)                W_ih^T   (resident across grid)
    whh_ref    : (H_pad, H_pad)            W_hh^T   (resident across grid)
    bias_ref   : (1, H_pad)                b_ih + b_hh
    out_ref    : (b_pad, H_pad)            final hidden state
    h_scratch  : VMEM (b_pad, H_pad)       hidden state carried across grid steps
    gi_scratch : VMEM (t_blk*b_pad, H_pad) block input projection
    """
    blk = pl.program_id(0)
    n_blk = pl.num_programs(0)

    @pl.when(blk == 0)
    def _():
        h_scratch[...] = jnp.zeros_like(h_scratch)

    # ---- Phase 1 (parallel): whole-block input projection, one MXU matmul,
    # biases folded in here -> removed from the serial chain. -----------------
    gi_scratch[...] = (
        jnp.dot(x_ref[...], wih_ref[...], preferred_element_type=jnp.float32)
        + bias_ref[...]
    )

    # ---- Phase 2 (serial): recurrence over the block; one matmul per step. --
    whh = whh_ref[...]

    def step(t, h):
        row = pl.multiple_of(t * b_pad, b_pad)
        gi_t = gi_scratch[pl.ds(row, b_pad), :]
        gh = jnp.dot(h, whh, preferred_element_type=jnp.float32)
        h_new = jnp.tanh(gi_t + gh)
        if seq_len is not None:
            # Only emitted when S is not a multiple of t_blk: padded timesteps
            # must not advance the hidden state.
            t_global = blk * t_blk + t
            h_new = jnp.where(t_global < seq_len, h_new, h)
        return h_new

    h = lax.fori_loop(0, t_blk, step, h_scratch[...], unroll=unroll)
    h_scratch[...] = h

    @pl.when(blk == n_blk - 1)
    def _():
        out_ref[...] = h.astype(out_ref.dtype)


def rnn_forward(inputs, w_ih, w_hh, b_ih, b_hh, *, t_blk=None):
    """inputs: (S, B, D); w_ih: (H, D); w_hh: (H, H); b_ih, b_hh: (H,)."""
    S, B, D = inputs.shape
    H = w_ih.shape[0]
    f32 = jnp.float32

    H_pad = _round_up(H, LANE)    # lane-dense hidden dim
    B_pad = _round_up(B, SUBLANE)  # sublane-dense batch dim

    if t_blk is None:
        t_blk = min(S, 128)        # timesteps per grid step (amortize overhead)
    n_blk = pl.cdiv(S, t_blk)
    S_pad = n_blk * t_blk

    # ---- Wrapper-side layout prep (all plain XLA ops) ------------------------
    x = jnp.zeros((S_pad, B_pad, D), f32).at[:S, :B, :].set(inputs.astype(f32))
    x = x.reshape(n_blk, t_blk * B_pad, D)          # rows: (t, b) row-major

    wih_t = jnp.zeros((D, H_pad), f32).at[:, :H].set(jnp.asarray(w_ih, f32).T)
    whh_t = jnp.zeros((H_pad, H_pad), f32).at[:H, :H].set(jnp.asarray(w_hh, f32).T)
    bias = jnp.zeros((1, H_pad), f32).at[0, :H].set(
        jnp.asarray(b_ih, f32) + jnp.asarray(b_hh, f32))

    kernel = functools.partial(
        _rnn_kernel,
        t_blk=t_blk,
        b_pad=B_pad,
        seq_len=(S if S_pad != S else None),
        unroll=(True if t_blk <= 32 else 8),
    )

    grid_spec = pltpu.PrefetchScalarGridSpec(
        num_scalar_prefetch=0,
        grid=(n_blk,),
        in_specs=[
            # time-block of inputs; leading block dim squeezed away
            pl.BlockSpec((pl.Squeezed(), t_blk * B_pad, D), lambda b: (b, 0, 0)),
            pl.BlockSpec((D, H_pad), lambda b: (0, 0)),       # W_ih^T (resident)
            pl.BlockSpec((H_pad, H_pad), lambda b: (0, 0)),   # W_hh^T (resident)
            pl.BlockSpec((1, H_pad), lambda b: (0, 0)),       # fused bias
        ],
        out_specs=pl.BlockSpec((B_pad, H_pad), lambda b: (0, 0)),
        scratch_shapes=[
            pltpu.VMEM((B_pad, H_pad), jnp.float32),           # hidden state
            pltpu.VMEM((t_blk * B_pad, H_pad), jnp.float32),   # block projection
        ],
    )

    out = pl.pallas_call(
        kernel,
        out_shape=jax.ShapeDtypeStruct((B_pad, H_pad), jnp.float32),
        grid_spec=grid_spec,
        compiler_params=pltpu.CompilerParams(
            dimension_semantics=("arbitrary",)),   # sequential over time blocks
    )(x, wih_t, whh_t, bias)

    return out[:B, :H]


def rnn_reference(inputs, w_ih, w_hh, b_ih, b_hh):
    S, B, D = inputs.shape
    H = w_ih.shape[0]
    h = jnp.zeros((B, H), jnp.float32)
    for t in range(S):
        h = jnp.tanh(inputs[t] @ w_ih.T + b_ih + h @ w_hh.T + b_hh)
    return h


if __name__ == "__main__":
    seq_len, batch, input_dim = 8, 4, 16
    hidden = HIDDEN_SIZE

    key = jax.random.PRNGKey(0)
    k_x, k_wih, k_whh, k_bih, k_bhh = jax.random.split(key, 5)

    # Deterministic parameter init (RNNCell shapes: W_ih (H,D), W_hh (H,H), b (H,))
    bound = 1.0 / jnp.sqrt(hidden)
    inputs = jax.random.normal(k_x, (seq_len, batch, input_dim), jnp.float32)
    w_ih = jax.random.uniform(k_wih, (hidden, input_dim), jnp.float32, -bound, bound)
    w_hh = jax.random.uniform(k_whh, (hidden, hidden), jnp.float32, -bound, bound)
    b_ih = jax.random.uniform(k_bih, (hidden,), jnp.float32, -bound, bound)
    b_hh = jax.random.uniform(k_bhh, (hidden,), jnp.float32, -bound, bound)

    out = rnn_forward(inputs, w_ih, w_hh, b_ih, b_hh)
    out = jax.block_until_ready(out)

    ref = rnn_reference(inputs, w_ih, w_hh, b_ih, b_hh)
    assert out.shape == (batch, hidden)
    assert jnp.allclose(out, ref, atol=1e-5, rtol=1e-5), (out, ref)

    print("KERNEL_OK")
</pallas_src>

<mosaic_0001>
module attributes {stable_mosaic.version = 11 : i64} {
  func.func @_rnn_kernel(%arg0: i32, %arg1: memref<1x64x16xf32, #tpu.memory_space<vmem>>, %arg2: memref<16x128xf32, #tpu.memory_space<vmem>>, %arg3: memref<128x128xf32, #tpu.memory_space<vmem>>, %arg4: memref<1x128xf32, #tpu.memory_space<vmem>>, %arg5: memref<8x128xf32, #tpu.memory_space<vmem>>, %arg6: memref<8x128xf32, #tpu.memory_space<vmem>>, %arg7: memref<64x128xf32, #tpu.memory_space<vmem>>) attributes {dimension_semantics = [#tpu.dimension_semantics<arbitrary>], iteration_bounds = array<i64: 1>, scalar_prefetch = 0 : i64, scratch_operands = 2 : i64, tpu.core_type = #tpu.core_type<tc>, window_params = [{transform_indices = @transform_0, window_bounds = array<i64: 1, 64, 16>}, {pipeline_mode = #tpu.pipeline_mode<synchronous>, transform_indices = @transform_1, window_bounds = array<i64: 16, 128>}, {pipeline_mode = #tpu.pipeline_mode<synchronous>, transform_indices = @transform_2, window_bounds = array<i64: 128, 128>}, {pipeline_mode = #tpu.pipeline_mode<synchronous>, transform_indices = @transform_3, window_bounds = array<i64: 1, 128>}, {pipeline_mode = #tpu.pipeline_mode<synchronous>, transform_indices = @transform_4, window_bounds = array<i64: 8, 128>}]} {
    %c0_i32 = arith.constant 0 : i32
    %0 = arith.cmpi eq, %arg0, %c0_i32 : i32
    %1 = arith.extui %0 : i1 to i32
    %c0_i32_0 = arith.constant 0 : i32
    %2 = arith.cmpi ne, %1, %c0_i32_0 : i32
    scf.if %2 {
      %cst_42 = arith.constant 0.000000e+00 : f32
      %73 = vector.broadcast %cst_42 : f32 to vector<8x128xf32>
      %c0_43 = arith.constant 0 : index
      %c0_44 = arith.constant 0 : index
      %74 = vector.load %arg6[%c0_43, %c0_44] : memref<8x128xf32, #tpu.memory_space<vmem>>, vector<8x128xf32>
      tpu.vector_store %arg6[%c0_43, %c0_44], %73 {strides = array<i32>} : memref<8x128xf32, #tpu.memory_space<vmem>>, vector<8x128xf32>,
    } else {
    }
    %c0 = arith.constant 0 : index
    %c0_1 = arith.constant 0 : index
    %c0_2 = arith.constant 0 : index
    %3 = vector.load %arg1[%c0, %c0_1, %c0_2] : memref<1x64x16xf32, #tpu.memory_space<vmem>>, vector<1x64x16xf32>
    %4 = vector.shape_cast %3 : vector<1x64x16xf32> to vector<64x16xf32>
    %c0_3 = arith.constant 0 : index
    %c0_4 = arith.constant 0 : index
    %5 = vector.load %arg2[%c0_3, %c0_4] : memref<16x128xf32, #tpu.memory_space<vmem>>, vector<16x128xf32>
    %cst = arith.constant dense<0.000000e+00> : vector<64x128xf32>
    %6 = tpu.matmul %4, %5, %cst {dimension_numbers = #tpu.dot_dimension_numbers<[1], [0], [0], [1], [0, 0, 1, 1], [], []>} : vector<64x16xf32>, vector<16x128xf32>, vector<64x128xf32> -> vector<64x128xf32>
    %c0_5 = arith.constant 0 : index
    %c0_6 = arith.constant 0 : index
    %7 = vector.load %arg4[%c0_5, %c0_6] : memref<1x128xf32, #tpu.memory_space<vmem>>, vector<1x128xf32>
    %8 = vector.broadcast %7 : vector<1x128xf32> to vector<64x128xf32>
    %9 = arith.addf %6, %8 : vector<64x128xf32>
    %c0_7 = arith.constant 0 : index
    %c0_8 = arith.constant 0 : index
    %10 = vector.load %arg7[%c0_7, %c0_8] : memref<64x128xf32, #tpu.memory_space<vmem>>, vector<64x128xf32>
    tpu.vector_store %arg7[%c0_7, %c0_8], %9 {strides = array<i32>} : memref<64x128xf32, #tpu.memory_space<vmem>>, vector<64x128xf32>,
    %c0_9 = arith.constant 0 : index
    %c0_10 = arith.constant 0 : index
    %11 = vector.load %arg3[%c0_9, %c0_10] : memref<128x128xf32, #tpu.memory_space<vmem>>, vector<128x128xf32>
    %c0_11 = arith.constant 0 : index
    %c0_12 = arith.constant 0 : index
    %12 = vector.load %arg6[%c0_11, %c0_12] : memref<8x128xf32, #tpu.memory_space<vmem>>, vector<8x128xf32>
    %c0_i32_13 = arith.constant 0 : i32
    %c8_i32 = arith.constant 8 : i32
    %13 = arith.muli %c0_i32_13, %c8_i32 : i32
    %14 = tpu.assume_multiple %13, 8 : i32
    %15 = arith.index_cast %14 : i32 to index
    %c0_14 = arith.constant 0 : index
    %16 = vector.load %arg7[%15, %c0_14] : memref<64x128xf32, #tpu.memory_space<vmem>>, vector<8x128xf32>
    %cst_15 = arith.constant dense<0.000000e+00> : vector<8x128xf32>
    %17 = tpu.matmul %12, %11, %cst_15 {dimension_numbers = #tpu.dot_dimension_numbers<[1], [0], [0], [1], [0, 0, 1, 1], [], []>} : vector<8x128xf32>, vector<128x128xf32>, vector<8x128xf32> -> vector<8x128xf32>
    %18 = arith.addf %16, %17 : vector<8x128xf32>
    %19 = math.tanh %18 : vector<8x128xf32>
    %c1_i32 = arith.constant 1 : i32
    %c8_i32_16 = arith.constant 8 : i32
    %20 = arith.muli %c1_i32, %c8_i32_16 : i32
    %21 = tpu.assume_multiple %20, 8 : i32
    %22 = arith.index_cast %21 : i32 to index
    %c0_17 = arith.constant 0 : index
    %23 = vector.load %arg7[%22, %c0_17] : memref<64x128xf32, #tpu.memory_space<vmem>>, vector<8x128xf32>
    %cst_18 = arith.constant dense<0.000000e+00> : vector<8x128xf32>
    %24 = tpu.matmul %19, %11, %cst_18 {dimension_numbers = #tpu.dot_dimension_numbers<[1], [0], [0], [1], [0, 0, 1, 1], [], []>} : vector<8x128xf32>, vector<128x128xf32>, vector<8x128xf32> -> vector<8x128xf32>
    %25 = arith.addf %23, %24 : vector<8x128xf32>
    %26 = math.tanh %25 : vector<8x128xf32>
    %c2_i32 = arith.constant 2 : i32
    %c8_i32_19 = arith.constant 8 : i32
    %27 = arith.muli %c2_i32, %c8_i32_19 : i32
    %28 = tpu.assume_multiple %27, 8 : i32
    %29 = arith.index_cast %28 : i32 to index
    %c0_20 = arith.constant 0 : index
    %30 = vector.load %arg7[%29, %c0_20] : memref<64x128xf32, #tpu.memory_space<vmem>>, vector<8x128xf32>
    %cst_21 = arith.constant dense<0.000000e+00> : vector<8x128xf32>
    %31 = tpu.matmul %26, %11, %cst_21 {dimension_numbers = #tpu.dot_dimension_numbers<[1], [0], [0], [1], [0, 0, 1, 1], [], []>} : vector<8x128xf32>, vector<128x128xf32>, vector<8x128xf32> -> vector<8x128xf32>
    %32 = arith.addf %30, %31 : vector<8x128xf32>
    %33 = math.tanh %32 : vector<8x128xf32>
    %c3_i32 = arith.constant 3 : i32
    %c8_i32_22 = arith.constant 8 : i32
    %34 = arith.muli %c3_i32, %c8_i32_22 : i32
    %35 = tpu.assume_multiple %34, 8 : i32
    %36 = arith.index_cast %35 : i32 to index
    %c0_23 = arith.constant 0 : index
    %37 = vector.load %arg7[%36, %c0_23] : memref<64x128xf32, #tpu.memory_space<vmem>>, vector<8x128xf32>
    %cst_24 = arith.constant dense<0.000000e+00> : vector<8x128xf32>
    %38 = tpu.matmul %33, %11, %cst_24 {dimension_numbers = #tpu.dot_dimension_numbers<[1], [0], [0], [1], [0, 0, 1, 1], [], []>} : vector<8x128xf32>, vector<128x128xf32>, vector<8x128xf32> -> vector<8x128xf32>
    %39 = arith.addf %37, %38 : vector<8x128xf32>
    %40 = math.tanh %39 : vector<8x128xf32>
    %c4_i32 = arith.constant 4 : i32
    %c8_i32_25 = arith.constant 8 : i32
    %41 = arith.muli %c4_i32, %c8_i32_25 : i32
    %42 = tpu.assume_multiple %41, 8 : i32
    %43 = arith.index_cast %42 : i32 to index
    %c0_26 = arith.constant 0 : index
    %44 = vector.load %arg7[%43, %c0_26] : memref<64x128xf32, #tpu.memory_space<vmem>>, vector<8x128xf32>
    %cst_27 = arith.constant dense<0.000000e+00> : vector<8x128xf32>
    %45 = tpu.matmul %40, %11, %cst_27 {dimension_numbers = #tpu.dot_dimension_numbers<[1], [0], [0], [1], [0, 0, 1, 1], [], []>} : vector<8x128xf32>, vector<128x128xf32>, vector<8x128xf32> -> vector<8x128xf32>
    %46 = arith.addf %44, %45 : vector<8x128xf32>
    %47 = math.tanh %46 : vector<8x128xf32>
    %c5_i32 = arith.constant 5 : i32
    %c8_i32_28 = arith.constant 8 : i32
    %48 = arith.muli %c5_i32, %c8_i32_28 : i32
    %49 = tpu.assume_multiple %48, 8 : i32
    %50 = arith.index_cast %49 : i32 to index
    %c0_29 = arith.constant 0 : index
    %51 = vector.load %arg7[%50, %c0_29] : memref<64x128xf32, #tpu.memory_space<vmem>>, vector<8x128xf32>
    %cst_30 = arith.constant dense<0.000000e+00> : vector<8x128xf32>
    %52 = tpu.matmul %47, %11, %cst_30 {dimension_numbers = #tpu.dot_dimension_numbers<[1], [0], [0], [1], [0, 0, 1, 1], [], []>} : vector<8x128xf32>, vector<128x128xf32>, vector<8x128xf32> -> vector<8x128xf32>
    %53 = arith.addf %51, %52 : vector<8x128xf32>
    %54 = math.tanh %53 : vector<8x128xf32>
    %c6_i32 = arith.constant 6 : i32
    %c8_i32_31 = arith.constant 8 : i32
    %55 = arith.muli %c6_i32, %c8_i32_31 : i32
    %56 = tpu.assume_multiple %55, 8 : i32
    %57 = arith.index_cast %56 : i32 to index
    %c0_32 = arith.constant 0 : index
    %58 = vector.load %arg7[%57, %c0_32] : memref<64x128xf32, #tpu.memory_space<vmem>>, vector<8x128xf32>
    %cst_33 = arith.constant dense<0.000000e+00> : vector<8x128xf32>
    %59 = tpu.matmul %54, %11, %cst_33 {dimension_numbers = #tpu.dot_dimension_numbers<[1], [0], [0], [1], [0, 0, 1, 1], [], []>} : vector<8x128xf32>, vector<128x128xf32>, vector<8x128xf32> -> vector<8x128xf32>
    %60 = arith.addf %58, %59 : vector<8x128xf32>
    %61 = math.tanh %60 : vector<8x128xf32>
    %c7_i32 = arith.constant 7 : i32
    %c8_i32_34 = arith.constant 8 : i32
    %62 = arith.muli %c7_i32, %c8_i32_34 : i32
    %63 = tpu.assume_multiple %62, 8 : i32
    %64 = arith.index_cast %63 : i32 to index
    %c0_35 = arith.constant 0 : index
    %65 = vector.load %arg7[%64, %c0_35] : memref<64x128xf32, #tpu.memory_space<vmem>>, vector<8x128xf32>
    %cst_36 = arith.constant dense<0.000000e+00> : vector<8x128xf32>
    %66 = tpu.matmul %61, %11, %cst_36 {dimension_numbers = #tpu.dot_dimension_numbers<[1], [0], [0], [1], [0, 0, 1, 1], [], []>} : vector<8x128xf32>, vector<128x128xf32>, vector<8x128xf32> -> vector<8x128xf32>
    %67 = arith.addf %65, %66 : vector<8x128xf32>
    %68 = math.tanh %67 : vector<8x128xf32>
    %c8_i32_37 = arith.constant 8 : i32
    %c0_38 = arith.constant 0 : index
    %c0_39 = arith.constant 0 : index
    %69 = vector.load %arg6[%c0_38, %c0_39] : memref<8x128xf32, #tpu.memory_space<vmem>>, vector<8x128xf32>
    tpu.vector_store %arg6[%c0_38, %c0_39], %68 {strides = array<i32>} : memref<8x128xf32, #tpu.memory_space<vmem>>, vector<8x128xf32>,
    %c0_i32_40 = arith.constant 0 : i32
    %70 = arith.cmpi eq, %arg0, %c0_i32_40 : i32
    %71 = arith.extui %70 : i1 to i32
    %c0_i32_41 = arith.constant 0 : i32
    %72 = arith.cmpi ne, %71, %c0_i32_41 : i32
    scf.if %72 {
      %c0_42 = arith.constant 0 : index
      %c0_43 = arith.constant 0 : index
      %73 = vector.load %arg5[%c0_42, %c0_43] : memref<8x128xf32, #tpu.memory_space<vmem>>, vector<8x128xf32>
      tpu.vector_store %arg5[%c0_42, %c0_43], %68 {strides = array<i32>} : memref<8x128xf32, #tpu.memory_space<vmem>>, vector<8x128xf32>,
    } else {
    }
    return
  }
  func.func @transform_0(%arg0: i32) -> (i32, i32, i32) {
    %c0_i32 = arith.constant 0 : i32
    %c0_i32_0 = arith.constant 0 : i32
    %c0_i32_1 = arith.constant 0 : i32
    return %arg0, %c0_i32, %c0_i32_0 : i32, i32, i32
  }
  func.func @transform_1(%arg0: i32) -> (i32, i32) {
    %c0_i32 = arith.constant 0 : i32
    %c0_i32_0 = arith.constant 0 : i32
    %c0_i32_1 = arith.constant 0 : i32
    return %c0_i32, %c0_i32_0 : i32, i32
  }
  func.func @transform_2(%arg0: i32) -> (i32, i32) {
    %c0_i32 = arith.constant 0 : i32
    %c0_i32_0 = arith.constant 0 : i32
    %c0_i32_1 = arith.constant 0 : i32
    return %c0_i32, %c0_i32_0 : i32, i32
  }
  func.func @transform_3(%arg0: i32) -> (i32, i32) {
    %c0_i32 = arith.constant 0 : i32
    %c0_i32_0 = arith.constant 0 : i32
    %c0_i32_1 = arith.constant 0 : i32
    return %c0_i32, %c0_i32_0 : i32, i32
  }
  func.func @transform_4(%arg0: i32) -> (i32, i32) {
    %c0_i32 = arith.constant 0 : i32
    %c0_i32_0 = arith.constant 0 : i32
    %c0_i32_1 = arith.constant 0 : i32
    return %c0_i32, %c0_i32_0 : i32, i32
  }
}

</mosaic_0001>

<bundles_post_ra>
// kernel: tpu_custom_call.1
= control target key start
LH: loop header
LB: loop body
LE: loop exit
PB: predicated region body
PF: predicated region fallthrough
CT: control target
= control target key end

     0   :  { %9 = vsyncpa [#allocation5], 0  ;;  %s1818_s0 = inlined_call_operand.vmem [shape: f32[1,64,16], index: 0, kind: input, shape index: {}]   ;;  %s1819_s1 = inlined_call_operand.vmem [shape: f32[16,128], index: 1, kind: input, shape index: {}]   ;;  %s1820_s2 = inlined_call_operand.hbm [shape: f32[128,128], index: 2, kind: input, shape index: {}]   ;;  %s1821_s3 = inlined_call_operand.vmem [shape: f32[1,128], index: 3, kind: input, shape index: {}]   ;;  %s1822_s4 = inlined_call_operand.hbm [shape: f32[8,128], index: 4, kind: output, shape index: {}]  }
   0x1   :  { %10 = vsyncpa [#allocation6], 0  ;;  %s1538_s15 = smov [#allocation4]   ;;  %s1490_s19 = scalar_lea.hbm %s1820_s2, 2048 }
   0x2   :  { %s20_s16 = sshll.u32 %s1538_s15, 4  ;;  %p1491_p0 = scmp.ne.s32.totalorder %s1820_s2, %s1490_s19  ;;  %s21_s16 = int_to_ptr.vmem [resolvable:$true] %s20_s16 }
   0x3   :  { %p1494_p1 = scmp.lt.u32.totalorder %s1490_s19, %s1820_s2 }
   0x5   :  { %p1496_p2 = pnand %p1494_p1, %p1491_p0 }
   0x7   :  { %1499 = shalt.err (!%p1496_p2)
}
   0x8   :  { %s1500_s24 = scalar_lea.vmem %s21_s16, 2048  ;;  %p1505_p4 = scmp.lt.s32.totalorder %s21_s16, %s21_s16 }
   0x9   :  { %p1501_p3 = scmp.ne.s32.totalorder %s21_s16, %s1500_s24  ;;  %p1506_p5 = scmp.lt.s32.totalorder %s1500_s24, %s1500_s24 }
   0xb   :  { %p1507_p6 = por %p1506_p5, %p1505_p4 }
   0xd   :  { %p1508_p7 = pnand %p1507_p6, %p1501_p3 }
   0xf   :  { %1511 = shalt.err (!%p1508_p7)
}
  0x10   :  { %s1539_s25 = smov 128   ;;  %s1540_s26 = smov 8  }
  0x11   :  { %26 = dma.hbm_to_vmem [thread:$0]  %s1820_s2, 2048, %s21_s16, [#allocation5], %s1539_s25, %s1539_s25, %s1540_s26  }
  0x12   :  { %1534 = dma.done.wait [#allocation5], 2048  }
  0x13   :  { %1535 = vsyncadd [#allocation5], 4294965248  ;;  %v1541_v0 = vmov 0.0|0.0   ;;  %vm1542_vm0 = vmmov 0   ;;  %v1543_v1 = vmov 0.0   ;;  %v192_v2 = vld [vmem:[#allocation4] sm:$0xff] }
  0x14   :  { %1275 = vmatprep.subr.bf16.mxu1 %v1541_v0  ;;  %1023 = vmatprep.mubr.msk.f32.mxu1 %vm1542_vm0, %v1543_v1  ;;  %v193_v3 = vld [vmem:[#allocation4 + $0x8] sm:$0xff]  ;;  %v194_v4 = vld [vmem:[#allocation4 + $0x10] sm:$0xff]  ;;  %v195_v6 = vld [vmem:[#allocation4 + $0x18] sm:$0xff]  ;;  %vm54_vm1 = vcmask 130048  }
  0x15   :  { %v1585_v5 = vpack.c.bf16 %v193_v3, %v192_v2  ;;  %v1588_v7 = vpack.c.bf16 %v195_v6, %v194_v4  ;;  %v196_v8 = vld [vmem:[#allocation4 + $0x20] sm:$0xff]  ;;  %v197_v9 = vld [vmem:[#allocation4 + $0x28] sm:$0xff]  ;;  %v198_v15 = vld [vmem:[#allocation4 + $0x30] sm:$0xff] }
  0x16   :  { %v45_v10 = vld [vmem:[%s1819_s1] sm:$0xff]  ;;  %v46_v11 = vld [vmem:[%s1819_s1 + $0x8] sm:$0xff]  ;;  %v1602_v14 = vpack.c.bf16 %v197_v9, %v196_v8  ;;  %v199_v16 = vld [vmem:[#allocation4 + $0x38] sm:$0xff] }
  0x17   :  { %1277 = vmatpush3.bf16.msra.mxu1 %v1585_v5  ;;  %v1271_v12 = vpack.c.bf16 %v46_v11, %v45_v10  ;;  %v37_v13 = vld [vmem:[%s1818_s0] sm:$0xff]  ;;  %v38_v17 = vld [vmem:[%s1818_s0 + $0x8] sm:$0xff]  ;;  %v1610_v18 = vpack.c.bf16 %v199_v16, %v198_v15  ;;  %v202_v22 = vld [vmem:[#allocation4 + $0x50] sm:$0xff] }
  0x18   :  { %1278 = vmatprep.subr.bf16.mxu1 %v1541_v0  ;;  %979 = vmatprep.mubr.msk.f32.mxu0 %vm54_vm1, %v37_v13  ;;  %v200_v19 = vld [vmem:[#allocation4 + $0x40] sm:$0xff]  ;;  %v201_v20 = vld [vmem:[#allocation4 + $0x48] sm:$0xff]  ;;  %v203_v23 = vld [vmem:[#allocation4 + $0x58] sm:$0xff] }
  0x19   :  { %1272 = vmatprep.subr.bf16.mxu0 %v1271_v12  ;;  %v1617_v21 = vpack.c.bf16 %v201_v20, %v200_v19  ;;  %v1623_v24 = vpack.c.bf16 %v203_v23, %v202_v22  ;;  %v204_v25 = vld [vmem:[#allocation4 + $0x60] sm:$0xff]  ;;  %v205_v26 = vld [vmem:[#allocation4 + $0x68] sm:$0xff]  ;;  %v206_v28 = vld [vmem:[#allocation4 + $0x70] sm:$0xff] }
  0x1a   :  { %1274 = vmatpush3.bf16.msra.mxu0 %v1271_v12  ;;  %v1629_v27 = vpack.c.bf16 %v205_v26, %v204_v25  ;;  %v207_v29 = vld [vmem:[#allocation4 + $0x78] sm:$0xff]  ;;  %v39_v31 = vld [vmem:[%s1818_s0 + $0x10] sm:$0xff]  ;;  %v41_v33 = vld [vmem:[%s1818_s0 + $0x20] sm:$0xff] }
  0x1b   :  { %1280 = vmatpush3.bf16.msra.mxu1 %v1588_v7  ;;  %1299 = vmatprep.subr.bf16.mxu0 %v1541_v0  ;;  %v1635_v30 = vpack.c.bf16 %v207_v29, %v206_v28  ;;  %v40_v32 = vld [vmem:[%s1818_s0 + $0x18] sm:$0xff]  ;;  %v42_v34 = vld [vmem:[%s1818_s0 + $0x28] sm:$0xff]  ;;  %v43_v35 = vld [vmem:[%s1818_s0 + $0x30] sm:$0xff] }
  0x1c   :  { %1281 = vmatprep.subr.bf16.mxu1 %v1541_v0  ;;  %v44_v36 = vld [vmem:[%s1818_s0 + $0x38] sm:$0xff]  ;;  %v1696_v39 = vld [vmem:[%s1821_s3] ss:$0 sm:$0xff]  ;;  %s1544_s0 = smov [#allocation7]  }
  0x1d   :  { %980 = vmatmul.mubr.msk.f32.vlgmr.msra.gmra.mrb[0].mxu0 %vm54_vm1, %v38_v17  ;;  %s811_s3 = sshll.u32 %s1544_s0, 4  ;;  %s812_s3 = int_to_ptr.vmem [resolvable:$true] %s811_s3 }
  0x1e   :  { %1301 = vmatpush3.bf16.msra.mxu0 %v1585_v5  ;;  %982 = vmatprep.mubr.msk.f32.mxu0 %vm54_vm1, %v39_v31  ;;  %s1512_s23 = scalar_lea.vmem %s812_s3, 128  ;;  %p1517_p9 = scmp.lt.s32.totalorder %s812_s3, %s812_s3 }
  0x1f   :  { %1283 = vmatpush3.bf16.msra.mxu1 %v1602_v14  ;;  %1302 = vmatprep.subr.bf16.mxu0 %v1541_v0  ;;  %p1513_p8 = scmp.ne.s32.totalorder %s812_s3, %s1512_s23  ;;  %p1518_p10 = scmp.lt.s32.totalorder %s1512_s23, %s1512_s23 }
  0x20   :  { %1284 = vmatprep.subr.bf16.mxu1 %v1541_v0 }
  0x21   :  { %983 = vmatmul.mubr.msk.f32.gmra.mrb[2].mxu0 %vm54_vm1, %v40_v32  ;;  %p1519_p11 = por %p1518_p10, %p1517_p9 }
  0x22   :  { %1304 = vmatpush3.bf16.msra.mxu0 %v1588_v7  ;;  %985 = vmatprep.mubr.msk.f32.mxu0 %vm54_vm1, %v41_v33 }
  0x23   :  { %1286 = vmatpush3.bf16.msra.mxu1 %v1610_v18  ;;  %1305 = vmatprep.subr.bf16.mxu0 %v1541_v0  ;;  %p1520_p12 = pnand %p1519_p11, %p1513_p8 }
  0x24   :  { %1287 = vmatprep.subr.bf16.mxu1 %v1541_v0 }
  0x25   :  { %986 = vmatmul.mubr.msk.f32.gmra.mrb[4].mxu0 %vm54_vm1, %v42_v34 }
  0x26   :  { %1307 = vmatpush3.bf16.msra.mxu0 %v1602_v14  ;;  %988 = vmatprep.mubr.msk.f32.mxu0 %vm54_vm1, %v43_v35 }
  0x27   :  { %1289 = vmatpush3.bf16.msra.mxu1 %v1617_v21  ;;  %1308 = vmatprep.subr.bf16.mxu0 %v1541_v0 }
  0x28   :  { %1290 = vmatprep.subr.bf16.mxu1 %v1541_v0 }
  0x29   :  { %989 = vmatmul.mubr.msk.f32.gmra.mrb[6].mxu0 %vm54_vm1, %v44_v36 }
  0x2a   :  { %1310 = vmatpush3.bf16.msra.mxu0 %v1610_v18  ;;  %1058 = vmatprep.mubr.msk.f32.mxu0 %vm1542_vm0, %v1543_v1 }
  0x2b   :  { %1292 = vmatpush3.bf16.msra.mxu1 %v1623_v24  ;;  %1311 = vmatprep.subr.bf16.mxu0 %v1541_v0 }
  0x2c   :  { %1293 = vmatprep.subr.bf16.mxu1 %v1541_v0 }
  0x2e   :  { %1313 = vmatpush3.bf16.msra.mxu0 %v1617_v21 }
  0x2f   :  { %1295 = vmatpush3.bf16.msra.mxu1 %v1629_v27  ;;  %1314 = vmatprep.subr.bf16.mxu0 %v1541_v0 }
  0x30   :  { %1296 = vmatprep.subr.bf16.mxu1 %v1541_v0 }
  0x32   :  { %1316 = vmatpush3.bf16.msra.mxu0 %v1623_v24 }
  0x33   :  { %1298 = vmatpush3.bf16.msra.mxu1 %v1635_v30  ;;  %1317 = vmatprep.subr.bf16.mxu0 %v1541_v0 }
  0x34   :  { %1323 = vmatprep.subr.bf16.mxu1 %v1541_v0 }
  0x36   :  { %1024 = vmatmul.mubr.f32.vlgmr.msra.gmra.mrb[0].mxu1 %v1543_v1  ;;  %1319 = vmatpush3.bf16.msra.mxu0 %v1629_v27 }
  0x37   :  { %1325 = vmatpush3.bf16.msra.mxu1 %v1585_v5  ;;  %1093 = vmatprep.mubr.msk.f32.mxu1 %vm1542_vm0, %v1543_v1 }
  0x38   :  { %1326 = vmatprep.subr.bf16.mxu1 %v1541_v0  ;;  %1320 = vmatprep.subr.bf16.mxu0 %v1541_v0 }
  0x3a   :  { %1322 = vmatpush3.bf16.msra.mxu0 %v1635_v30 }
  0x3b   :  { %1328 = vmatpush3.bf16.msra.mxu1 %v1588_v7  ;;  %1347 = vmatprep.subr.bf16.mxu0 %v1541_v0 }
  0x3c   :  { %1329 = vmatprep.subr.bf16.mxu1 %v1541_v0 }
  0x3f   :  { %1331 = vmatpush3.bf16.msra.mxu1 %v1602_v14 }
  0x40   :  { %1332 = vmatprep.subr.bf16.mxu1 %v1541_v0 }
  0x43   :  { %1334 = vmatpush3.bf16.msra.mxu1 %v1610_v18 }
  0x44   :  { %1335 = vmatprep.subr.bf16.mxu1 %v1541_v0 }
  0x47   :  { %1337 = vmatpush3.bf16.msra.mxu1 %v1617_v21 }
  0x48   :  { %1338 = vmatprep.subr.bf16.mxu1 %v1541_v0 }
  0x4b   :  { %1340 = vmatpush3.bf16.msra.mxu1 %v1623_v24 }
  0x4c   :  { %1341 = vmatprep.subr.bf16.mxu1 %v1541_v0 }
  0x4f   :  { %1343 = vmatpush3.bf16.msra.mxu1 %v1629_v27 }
  0x50   :  { %1344 = vmatprep.subr.bf16.mxu1 %v1541_v0 }
  0x53   :  { %1346 = vmatpush3.bf16.msra.mxu1 %v1635_v30 }
  0x54   :  { %1371 = vmatprep.subr.bf16.mxu1 %v1541_v0 }
  0xf0   :  { %v981_v37 = vpop.f32.mrb[0].mxu0 }
  0xf1   :  { %v145_v38 = vpop.f32.mrb[1].mxu0  ;;  %v151_v51 = vadd.f32 %v981_v37, %v1696_v39 }
  0xf2   :  { %v146_v40 = vadd.f32 %v1696_v39, %v145_v38 }
  0xf4   :  { %v984_v45 = vpop.f32.mrb[2].mxu0 }
  0xf5   :  { %v155_v46 = vpop.f32.mrb[3].mxu0  ;;  %v161_v61 = vadd.f32 %v984_v45, %v1696_v39 }
  0xf6   :  { %v156_v56 = vadd.f32 %v1696_v39, %v155_v46 }
  0xf8   :  { %v1717_v47 = vpop.f32.mrb[4].mxu0 }
  0xf9   :  { %v1719_v48 = vpop.f32.mrb[5].mxu0 }
  0xfa   :  { %v166_v4 = vadd.f32 %v1696_v39, %v1719_v48 }
  0xfc   :  { %v1721_v49 = vpop.f32.mrb[6].mxu0 }
  0xfd   :  { %v1723_v50 = vpop.f32.mrb[7].mxu0 }
  0xfe   :  { %v176_v13 = vadd.f32 %v1696_v39, %v1723_v50 }
 0x109   :  { %v276_v41 = vpop.f32.mrb[0].mxu1 }
 0x10a   :  { %v280_v42 = vadd.f32 %v276_v41, %v146_v40  ;;  %v1025_v43 = vpop.f32.mrb[1].mxu1 }
 0x10c   :  { %1474 = vtanh.f32 %v280_v42 }
 0x116   :  { %v1475_v44 = vpop.eup %1474 }
 0x117   :  { %1059 = vmatmul.mubr.f32.vlgmr.msra.gmra.mrb[8].mxu0 %v1475_v44 }
 0x118   :  { %1349 = vmatpush3.bf16.msra.mxu0 %v1585_v5  ;;  %1128 = vmatprep.mubr.msk.f32.mxu0 %vm1542_vm0, %v1543_v1 }
 0x119   :  { %1350 = vmatprep.subr.bf16.mxu0 %v1541_v0 }
 0x11c   :  { %1352 = vmatpush3.bf16.msra.mxu0 %v1588_v7 }
 0x11d   :  { %1353 = vmatprep.subr.bf16.mxu0 %v1541_v0 }
 0x120   :  { %1355 = vmatpush3.bf16.msra.mxu0 %v1602_v14 }
 0x121   :  { %1356 = vmatprep.subr.bf16.mxu0 %v1541_v0 }
 0x124   :  { %1358 = vmatpush3.bf16.msra.mxu0 %v1610_v18 }
 0x125   :  { %1359 = vmatprep.subr.bf16.mxu0 %v1541_v0 }
 0x128   :  { %1361 = vmatpush3.bf16.msra.mxu0 %v1617_v21 }
 0x129   :  { %1362 = vmatprep.subr.bf16.mxu0 %v1541_v0 }
 0x12c   :  { %1364 = vmatpush3.bf16.msra.mxu0 %v1623_v24 }
 0x12d   :  { %1365 = vmatprep.subr.bf16.mxu0 %v1541_v0 }
 0x130   :  { %1367 = vmatpush3.bf16.msra.mxu0 %v1629_v27 }
 0x131   :  { %1368 = vmatprep.subr.bf16.mxu0 %v1541_v0 }
 0x134   :  { %1370 = vmatpush3.bf16.msra.mxu0 %v1635_v30 }
 0x135   :  { %1395 = vmatprep.subr.bf16.mxu0 %v1541_v0 }
 0x1ea   :  { %v350_v52 = vpop.f32.mrb[8].mxu0 }
 0x1eb   :  { %v354_v53 = vadd.f32 %v350_v52, %v151_v51  ;;  %v1060_v54 = vpop.f32.mrb[9].mxu0 }
 0x1ed   :  { %1476 = vtanh.f32 %v354_v53 }
 0x1f7   :  { %v1477_v55 = vpop.eup %1476 }
 0x1f8   :  { %1094 = vmatmul.mubr.f32.vlgmr.msra.gmra.mrb[2].mxu1 %v1477_v55 }
 0x1f9   :  { %1373 = vmatpush3.bf16.msra.mxu1 %v1585_v5  ;;  %1163 = vmatprep.mubr.msk.f32.mxu1 %vm1542_vm0, %v1543_v1 }
 0x1fa   :  { %1374 = vmatprep.subr.bf16.mxu1 %v1541_v0 }
 0x1fd   :  { %1376 = vmatpush3.bf16.msra.mxu1 %v1588_v7 }
 0x1fe   :  { %1377 = vmatprep.subr.bf16.mxu1 %v1541_v0 }
 0x201   :  { %1379 = vmatpush3.bf16.msra.mxu1 %v1602_v14 }
 0x202   :  { %1380 = vmatprep.subr.bf16.mxu1 %v1541_v0 }
 0x205   :  { %1382 = vmatpush3.bf16.msra.mxu1 %v1610_v18 }
 0x206   :  { %1383 = vmatprep.subr.bf16.mxu1 %v1541_v0 }
 0x209   :  { %1385 = vmatpush3.bf16.msra.mxu1 %v1617_v21 }
 0x20a   :  { %1386 = vmatprep.subr.bf16.mxu1 %v1541_v0 }
 0x20d   :  { %1388 = vmatpush3.bf16.msra.mxu1 %v1623_v24 }
 0x20e   :  { %1389 = vmatprep.subr.bf16.mxu1 %v1541_v0 }
 0x211   :  { %1391 = vmatpush3.bf16.msra.mxu1 %v1629_v27 }
 0x212   :  { %1392 = vmatprep.subr.bf16.mxu1 %v1541_v0 }
 0x215   :  { %1394 = vmatpush3.bf16.msra.mxu1 %v1635_v30 }
 0x216   :  { %1419 = vmatprep.subr.bf16.mxu1 %v1541_v0 }
 0x2cb   :  { %v424_v57 = vpop.f32.mrb[2].mxu1 }
 0x2cc   :  { %v428_v58 = vadd.f32 %v424_v57, %v156_v56  ;;  %v1095_v59 = vpop.f32.mrb[3].mxu1 }
 0x2ce   :  { %1478 = vtanh.f32 %v428_v58 }
 0x2d8   :  { %v1479_v60 = vpop.eup %1478 }
 0x2d9   :  { %1129 = vmatmul.mubr.f32.vlgmr.msra.gmra.mrb[10].mxu0 %v1479_v60 }
 0x2da   :  { %1397 = vmatpush3.bf16.msra.mxu0 %v1585_v5  ;;  %1198 = vmatprep.mubr.msk.f32.mxu0 %vm1542_vm0, %v1543_v1 }
 0x2db   :  { %1398 = vmatprep.subr.bf16.mxu0 %v1541_v0 }
 0x2de   :  { %1400 = vmatpush3.bf16.msra.mxu0 %v1588_v7 }
 0x2df   :  { %1401 = vmatprep.subr.bf16.mxu0 %v1541_v0 }
 0x2e2   :  { %1403 = vmatpush3.bf16.msra.mxu0 %v1602_v14 }
 0x2e3   :  { %1404 = vmatprep.subr.bf16.mxu0 %v1541_v0 }
 0x2e6   :  { %1406 = vmatpush3.bf16.msra.mxu0 %v1610_v18 }
 0x2e7   :  { %1407 = vmatprep.subr.bf16.mxu0 %v1541_v0 }
 0x2ea   :  { %1409 = vmatpush3.bf16.msra.mxu0 %v1617_v21 }
 0x2eb   :  { %1410 = vmatprep.subr.bf16.mxu0 %v1541_v0 }
 0x2ee   :  { %1412 = vmatpush3.bf16.msra.mxu0 %v1623_v24 }
 0x2ef   :  { %1413 = vmatprep.subr.bf16.mxu0 %v1541_v0 }
 0x2f2   :  { %1415 = vmatpush3.bf16.msra.mxu0 %v1629_v27 }
 0x2f3   :  { %1416 = vmatprep.subr.bf16.mxu0 %v1541_v0 }
 0x2f6   :  { %1418 = vmatpush3.bf16.msra.mxu0 %v1635_v30 }
 0x2f7   :  { %1443 = vmatprep.subr.bf16.mxu0 %v1541_v0 }
 0x3ac   :  { %v498_v62 = vpop.f32.mrb[10].mxu0 }
 0x3ad   :  { %v502_v63 = vadd.f32 %v498_v62, %v161_v61  ;;  %v1130_v2 = vpop.f32.mrb[11].mxu0 }
 0x3af   :  { %1480 = vtanh.f32 %v502_v63 }
 0x3b9   :  { %v1481_v3 = vpop.eup %1480 }
 0x3ba   :  { %1164 = vmatmul.mubr.f32.vlgmr.msra.gmra.mrb[4].mxu1 %v1481_v3 }
 0x3bb   :  { %1421 = vmatpush3.bf16.msra.mxu1 %v1585_v5  ;;  %1233 = vmatprep.mubr.msk.f32.mxu1 %vm1542_vm0, %v1543_v1 }
 0x3bc   :  { %1422 = vmatprep.subr.bf16.mxu1 %v1541_v0 }
 0x3bf   :  { %1424 = vmatpush3.bf16.msra.mxu1 %v1588_v7 }
 0x3c0   :  { %1425 = vmatprep.subr.bf16.mxu1 %v1541_v0 }
 0x3c3   :  { %1427 = vmatpush3.bf16.msra.mxu1 %v1602_v14 }
 0x3c4   :  { %1428 = vmatprep.subr.bf16.mxu1 %v1541_v0 }
 0x3c7   :  { %1430 = vmatpush3.bf16.msra.mxu1 %v1610_v18 }
 0x3c8   :  { %1431 = vmatprep.subr.bf16.mxu1 %v1541_v0 }
 0x3cb   :  { %1433 = vmatpush3.bf16.msra.mxu1 %v1617_v21 }
 0x3cc   :  { %1434 = vmatprep.subr.bf16.mxu1 %v1541_v0 }
 0x3cf   :  { %1436 = vmatpush3.bf16.msra.mxu1 %v1623_v24 }
 0x3d0   :  { %1437 = vmatprep.subr.bf16.mxu1 %v1541_v0 }
 0x3d3   :  { %1439 = vmatpush3.bf16.msra.mxu1 %v1629_v27 }
 0x3d4   :  { %1440 = vmatprep.subr.bf16.mxu1 %v1541_v0 }
 0x3d7   :  { %1442 = vmatpush3.bf16.msra.mxu1 %v1635_v30 }
 0x48d   :  { %v572_v6 = vpop.f32.mrb[4].mxu1 }
 0x48e   :  { %v576_v8 = vadd.f32 %v572_v6, %v166_v4  ;;  %v1165_v9 = vpop.f32.mrb[5].mxu1 }
 0x490   :  { %1482 = vtanh.f32 %v576_v8 }
 0x49a   :  { %v1483_v10 = vpop.eup %1482 }
 0x49b   :  { %1199 = vmatmul.mubr.f32.vlgmr.msra.gmra.mrb[12].mxu0 %v1483_v10 }
 0x49c   :  { %1445 = vmatpush3.bf16.msra.mxu0 %v1585_v5  ;;  %1268 = vmatprep.mubr.msk.f32.mxu0 %vm1542_vm0, %v1543_v1  ;;  %v171_v1 = vadd.f32 %v1717_v47, %v1696_v39 }
 0x49d   :  { %1446 = vmatprep.subr.bf16.mxu0 %v1541_v0 }
 0x4a0   :  { %1448 = vmatpush3.bf16.msra.mxu0 %v1588_v7 }
 0x4a1   :  { %1449 = vmatprep.subr.bf16.mxu0 %v1541_v0 }
 0x4a4   :  { %1451 = vmatpush3.bf16.msra.mxu0 %v1602_v14 }
 0x4a5   :  { %1452 = vmatprep.subr.bf16.mxu0 %v1541_v0 }
 0x4a8   :  { %1454 = vmatpush3.bf16.msra.mxu0 %v1610_v18 }
 0x4a9   :  { %1455 = vmatprep.subr.bf16.mxu0 %v1541_v0 }
 0x4ac   :  { %1457 = vmatpush3.bf16.msra.mxu0 %v1617_v21 }
 0x4ad   :  { %1458 = vmatprep.subr.bf16.mxu0 %v1541_v0 }
 0x4b0   :  { %1460 = vmatpush3.bf16.msra.mxu0 %v1623_v24 }
 0x4b1   :  { %1461 = vmatprep.subr.bf16.mxu0 %v1541_v0 }
 0x4b4   :  { %1463 = vmatpush3.bf16.msra.mxu0 %v1629_v27 }
 0x4b5   :  { %1464 = vmatprep.subr.bf16.mxu0 %v1541_v0  ;;  %v181_v0 = vadd.f32 %v1721_v49, %v1696_v39 }
 0x4b8   :  { %1466 = vmatpush3.bf16.msra.mxu0 %v1635_v30 }
 0x56e   :  { %v646_v5 = vpop.f32.mrb[12].mxu0 }
 0x56f   :  { %v650_v7 = vadd.f32 %v646_v5, %v171_v1  ;;  %v1200_v11 = vpop.f32.mrb[13].mxu0 }
 0x571   :  { %1484 = vtanh.f32 %v650_v7 }
 0x57b   :  { %v1485_v12 = vpop.eup %1484 }
 0x57c   :  { %1234 = vmatmul.mubr.f32.vlgmr.msra.gmra.mrb[6].mxu1 %v1485_v12 }
 0x64f   :  { %v720_v14 = vpop.f32.mrb[6].mxu1 }
 0x650   :  { %v724_v15 = vadd.f32 %v720_v14, %v176_v13  ;;  %v1235_v16 = vpop.f32.mrb[7].mxu1 }
 0x652   :  { %1486 = vtanh.f32 %v724_v15 }
 0x65c   :  { %v1487_v17 = vpop.eup %1486 }
 0x65d   :  { %1269 = vmatmul.mubr.f32.vlgmr.msra.gmra.mrb[14].mxu0 %v1487_v17 }
 0x730   :  { %v794_v18 = vpop.f32.mrb[14].mxu0 }
 0x731   :  { %v798_v19 = vadd.f32 %v794_v18, %v181_v0  ;;  %v1270_v20 = vpop.f32.mrb[15].mxu0 }
 0x733   :  { %1488 = vtanh.f32 %v798_v19 }
 0x73d   :  { %v1489_v21 = vpop.eup %1488 }
 0x73e   :  { %804 = vst [vmem:[#allocation7] sm:$0xff] %v1489_v21 }
 0x73f   :  { %1523 = shalt.err (!%p1520_p12)
}
 0x740   :  { %s1524_s26 = scalar_lea.hbm %s1822_s4, 128 }
 0x741   :  { %p1525_p13 = scmp.ne.s32.totalorder %s1822_s4, %s1524_s26  ;;  %p1528_p0 = scmp.lt.u32.totalorder %s1524_s26, %s1822_s4 }
 0x743   :  { %p1530_p1 = pnand %p1528_p0, %p1525_p13 }
 0x745   :  { %1533 = shalt.err (!%p1530_p1)
}
 0x746   :  { %814 = dma.vmem_to_hbm [thread:$0]  %s812_s3, 128, %s1822_s4, [#allocation6]  }
 0x747   :  { %1536 = dma.done.wait [#allocation6], 128  }
 0x748   :  { %1537 = vsyncadd [#allocation6], 4294967168 }
 0x749   :  { %818 = vsyncpa [#allocation5], 1 }
 0x74a   :  { %819 = vsyncpa [#allocation6], 1 }

</bundles_post_ra>
